<compile_context>
chip_gen: v6e
topology: v6e:2x2x1
jax: 0.10.0
libtpu: 0.0.40
codegen_flags: <defaults>
</compile_context>

<pallas_src>
import jax
import jax.numpy as jnp
from jax.experimental import pallas as pl
from jax.experimental.pallas import tpu as pltpu

LANE = 128          # layer output widths are padded to the TPU lane width
SUBLANE = 8
K1 = 8              # padded contraction width of the first per-point layer (4->8)
MAX_TILE_N = 4096   # cap on point-tile rows (x block + intermediates stay a few MiB)
_NEG = float(jnp.finfo(jnp.float32).min)   # finite "-inf" for the running max

HIGH = jax.lax.Precision.HIGHEST


def _round_up(v, m):
    return ((v + m - 1) // m) * m


def _mm(a, b):
    return jnp.matmul(a, b, precision=HIGH)


# ----------------------------------------------------------------------------
# Padding helpers
# ----------------------------------------------------------------------------
def _pad_w(w, k_pad=LANE, dtype=jnp.float32):
    """Pad a (k, n) weight to (k_pad, LANE)."""
    k, n = w.shape
    assert k <= k_pad and n <= LANE
    return jnp.zeros((k_pad, LANE), dtype).at[:k, :n].set(w.astype(dtype))


def _pad_w_batched(w, k_pad, dtype):
    """Pad a per-batch (B, k, n) weight to (B, k_pad, LANE)."""
    b, k, n = w.shape
    assert k <= k_pad and n <= LANE
    return jnp.zeros((b, k_pad, LANE), dtype).at[:, :k, :n].set(w.astype(dtype))


def _pad_b(b):
    (n,) = b.shape
    assert n <= LANE
    return jnp.zeros((1, LANE), jnp.float32).at[0, :n].set(b.astype(jnp.float32))


def _pad_points(x, n_pad):
    """(B, N, C) f32 -> (B, n_pad, K1) bf16.

    Channels are zero-padded C->K1 (the matching weight rows are zero, so the
    matmul is unchanged).  Extra point rows are copies of the LAST real point,
    so the max over points needs no in-kernel row mask.
    """
    b, n, c = x.shape
    assert c <= K1
    x8 = jnp.zeros((b, n, K1), jnp.float32).at[:, :, :c].set(x.astype(jnp.float32))
    if n_pad > n:
        pad = jnp.broadcast_to(x8[:, n - 1:n, :], (b, n_pad - n, K1))
        x8 = jnp.concatenate([x8, pad], axis=1)
    return x8.astype(jnp.bfloat16)


# ----------------------------------------------------------------------------
# Fused Pallas kernel: per-point MLP -> running max over points -> head MLP
# ----------------------------------------------------------------------------
def _make_fused_kernel(pt_relu, hd_relu):
    """Grid = (B, num_point_tiles); batch 'parallel', point axis 'arbitrary'.

    Intermediate activations never touch HBM; the only HBM write is one
    (1, 8, 128) head output per batch element.
    """
    n_pt = len(pt_relu)
    n_hd = len(hd_relu)
    n_params = 2 * (n_pt + n_hd)

    def kernel(x_ref, *args):
        param_refs = args[:n_params]
        out_ref = args[n_params]
        maxacc = args[n_params + 1]                 # VMEM scratch (8, LANE) f32

        i = pl.program_id(1)

        @pl.when(i == 0)
        def _init():
            maxacc[...] = jnp.full_like(maxacc, _NEG)

        # ---- shared per-point MLP (bf16 MXU inputs, f32 accumulate/epilogue)
        h = x_ref[0]                                # (tile_n, K1) bf16
        for l in range(n_pt):
            w_ref = param_refs[2 * l]
            b_ref = param_refs[2 * l + 1]
            w = w_ref[0] if len(w_ref.shape) == 3 else w_ref[...]
            a = jnp.dot(h, w, preferred_element_type=jnp.float32) + b_ref[...]
            if pt_relu[l]:
                a = jnp.maximum(a, 0.0)
            # Re-quantize to bf16 between per-point layers (full-rate MXU);
            # the last layer feeds the f32 running max directly.
            h = a.astype(jnp.bfloat16) if l + 1 < n_pt else a

        # ---- online max over the point axis (no mask: pads are real points)
        tile_max = jnp.max(h, axis=0, keepdims=True)        # (1, LANE)
        maxacc[...] = jnp.maximum(maxacc[...], tile_max)    # broadcast to 8 rows

        # ---- head MLP (f32, runs once per batch on the last point tile) ----
        @pl.when(i == pl.num_programs(1) - 1)
        def _head():
            g = maxacc[...]                          # (8, LANE), equal rows
            for l in range(n_hd):
                w_ref = param_refs[2 * (n_pt + l)]
                b_ref = param_refs[2 * (n_pt + l) + 1]
                w = w_ref[0] if len(w_ref.shape) == 3 else w_ref[...]
                g = jnp.dot(g, w, preferred_element_type=jnp.float32) + b_ref[...]
                if hd_relu[l]:
                    g = jnp.maximum(g, 0.0)
            out_ref[...] = jnp.expand_dims(g, 0).astype(out_ref.dtype)

    return kernel


def fused_point_mlp(x_pad, pt_layers, hd_layers, *, tile_n):
    """One pallas_call: shared per-point MLP + global max-pool + head MLP.

    x_pad     : (B, N_pad, K1) bf16 point cloud (channel/row padded).
    pt_layers : list of (w, b, relu); w is (k_pad, LANE) bf16 shared or
                (B, k_pad, LANE) bf16 per-batch, b is (1, LANE) f32.
    hd_layers : same, f32, applied once per batch to the global-max feature.
    Returns   : (B, LANE) lane-padded head output (caller slices).
    """
    B, n_pad, cin = x_pad.shape
    assert n_pad % tile_n == 0
    nt = n_pad // tile_n

    pt_relu = tuple(bool(r) for (_, _, r) in pt_layers)
    hd_relu = tuple(bool(r) for (_, _, r) in hd_layers)
    kernel = _make_fused_kernel(pt_relu, hd_relu)

    # x is the only large streamed operand: (1, tile_n, K1), last dim == full
    # array extent (legal even though < 128 lanes).
    in_specs = [pl.BlockSpec((1, tile_n, cin), lambda b, i: (b, i, 0))]
    operands = [x_pad]
    for (w, bias, _) in list(pt_layers) + list(hd_layers):
        if w.ndim == 3:     # per-batch weight (folded T @ W1): one slab per b
            in_specs.append(
                pl.BlockSpec((1, w.shape[1], LANE), lambda b, i: (b, 0, 0)))
        else:               # shared weight: VMEM-resident across the grid
            in_specs.append(
                pl.BlockSpec((w.shape[0], LANE), lambda b, i: (0, 0)))
        in_specs.append(pl.BlockSpec((1, LANE), lambda b, i: (0, 0)))
        operands += [w, bias]

    out = pl.pallas_call(
        kernel,
        out_shape=jax.ShapeDtypeStruct((B, SUBLANE, LANE), jnp.float32),
        grid=(B, nt),
        in_specs=in_specs,
        out_specs=pl.BlockSpec((1, SUBLANE, LANE), lambda b, i: (b, 0, 0)),
        scratch_shapes=[pltpu.VMEM((SUBLANE, LANE), jnp.float32)],
        compiler_params=pltpu.CompilerParams(
            dimension_semantics=("parallel", "arbitrary"),
            vmem_limit_bytes=32 * 1024 * 1024,   # <= 48 MiB: safe on v7x as well
        ),
    )(*operands)
    return out[:, 0, :]


# ----------------------------------------------------------------------------
# PointNet forward (glue in plain JAX, all heavy lifting in the 2 fused kernels)
# ----------------------------------------------------------------------------
def pointnet_forward(x, net_params):
    by_type = {blk["type"]: blk for blk in net_params}
    transform = by_type["transform"]
    extraction = by_type["extraction"]
    classification = by_type["classification"]

    B, N, _ = x.shape
    # Few large point tiles (each grid step costs ~0.35 us of pipeline overhead);
    # tile_n is a multiple of 16 for bf16 sublane packing, row padding < 16/tile.
    nt = -(-N // MAX_TILE_N)
    tile_n = _round_up(-(-N // nt), 16)
    x_pad = _pad_points(x, nt * tile_n)               # (B, nt*tile_n, K1) bf16
    # TODO(synk): on v7x with B == 1, shard the point axis across the two
    # TensorCores (core-parallel leading axis + partial-max combine) so both
    # cores are busy; with the batch-'parallel' grid one TC idles when B < 2.

    # --- Transform / T-Net : single fused kernel over the point cloud -------
    lnet = transform["lnet"]
    pt_layers = [(_pad_w(lnet[0][0], K1, jnp.bfloat16), _pad_b(lnet[0][1]), lnet[0][2])]
    pt_layers += [(_pad_w(w, LANE, jnp.bfloat16), _pad_b(b), r) for (w, b, r) in lnet[1:]]
    hd_layers = [(_pad_w(w, LANE, jnp.float32), _pad_b(b), r) for (w, b, r) in transform["gnet"]]
    w_fc, b_fc = transform["fc"]
    hd_layers += [(_pad_w(w_fc, LANE, jnp.float32), _pad_b(b_fc), False)]
    m = transform["matrix_size"]
    t_flat = fused_point_mlp(x_pad, pt_layers, hd_layers, tile_n=tile_n)
    T = t_flat[:, :m * m].reshape(B, m, m)

    # --- torch.bmm(x, T) folded into the first extraction layer -------------
    #     (x @ T) @ W1 == x @ (T @ W1): a tiny (B,4,4)@(4,32) fold replaces the
    #     per-point bmm kernel and the HBM round trip of the transformed cloud.
    (w1, b1, r1) = extraction["blocks"][0]
    w1_eff = jnp.einsum("bij,jk->bik", T, w1, precision=HIGH)      # (B, 4, 32)
    pt_layers = [(_pad_w_batched(w1_eff, K1, jnp.bfloat16), _pad_b(b1), r1)]
    pt_layers += [(_pad_w(w, LANE, jnp.bfloat16), _pad_b(b), r)
                  for (w, b, r) in extraction["blocks"][1:]]
    hd_layers = [(_pad_w(w, LANE, jnp.float32), _pad_b(b), r)
                 for (w, b, r) in classification["blocks"]]

    # --- extraction + globalization + classification : one fused kernel -----
    y_pad = fused_point_mlp(x_pad, pt_layers, hd_layers, tile_n=tile_n)
    n_out = classification["blocks"][-1][0].shape[1]
    return y_pad[:, :n_out], [T]


# ----------------------------------------------------------------------------
# Deterministic parameter construction (normalize=False -> bias=True, no BN)
# ----------------------------------------------------------------------------
def init_linear(key, fin, fout):
    kw, kb = jax.random.split(key)
    w = jax.random.normal(kw, (fin, fout), jnp.float32) / jnp.sqrt(jnp.float32(fin))
    b = 0.01 * jax.random.normal(kb, (fout,), jnp.float32)
    return w, b


def build_params(key):
    # Config: transform(matrix_size=4): lnet 4->32->64, gnet 64->32, fc 32->16
    #         extraction 4->32->64; globalization; classification 64->32->10
    keys = jax.random.split(key, 16)
    ki = iter(keys)

    def layer(fin, fout, relu):
        w, b = init_linear(next(ki), fin, fout)
        return (w, b, relu)

    transform = {
        "type": "transform",
        "matrix_size": 4,
        "lnet": [layer(4, 32, True), layer(32, 64, True)],
        "gnet": [layer(64, 32, True)],
        "fc": init_linear(next(ki), 32, 16),     # 16 == matrix_size ** 2
    }
    extraction = {
        "type": "extraction",
        "blocks": [layer(4, 32, True), layer(32, 64, True)],
    }
    globalization = {"type": "globalization"}
    classification = {
        "type": "classification",
        "blocks": [layer(64, 32, True), layer(32, 10, False)],
    }
    return [transform, extraction, globalization, classification]


# ----------------------------------------------------------------------------
# References: exact f32 (module semantics) and bf16-aware (kernel quantization)
# ----------------------------------------------------------------------------
def _reference_forward(x, net_params):
    """Pure-f32 reference mirroring the PyTorch module."""
    by_type = {blk["type"]: blk for blk in net_params}
    transform = by_type["transform"]
    extraction = by_type["extraction"]
    classification = by_type["classification"]

    def mlp(y, layers):
        for w, b, r in layers:
            y = _mm(y, w) + b
            if r:
                y = jnp.maximum(y, 0.0)
        return y

    B = x.shape[0]
    t = mlp(x, transform["lnet"])
    t = jnp.max(t, axis=1)
    t = mlp(t, transform["gnet"])
    w_fc, b_fc = transform["fc"]
    t = _mm(t, w_fc) + b_fc
    m = transform["matrix_size"]
    T = t.reshape(B, m, m)

    y = jnp.einsum("bnc,bcd->bnd", x, T, precision=HIGH)   # torch.bmm(x, T)
    y = mlp(y, extraction["blocks"])                       # extraction
    y = jnp.max(y, axis=1)                                 # globalization
    y = mlp(y, classification["blocks"])                   # classification
    return y, [T]


def _reference_forward_bf16(x, net_params):
    """Reference mirroring the kernel's bf16 quantization points
    (bf16 per-point matmul inputs/weights, f32 accumulation, f32 heads)."""
    q = lambda v: v.astype(jnp.bfloat16).astype(jnp.float32)
    by_type = {blk["type"]: blk for blk in net_params}
    transform = by_type["transform"]
    extraction = by_type["extraction"]
    classification = by_type["classification"]

    def pt_mlp(y, layers):
        y = q(y)
        for idx, (w, b, r) in enumerate(layers):
            y = _mm(y, q(w)) + b
            if r:
                y = jnp.maximum(y, 0.0)
            if idx + 1 < len(layers):
                y = q(y)
        return y

    def f32_mlp(y, layers):
        for (w, b, r) in layers:
            y = _mm(y, w) + b
            if r:
                y = jnp.maximum(y, 0.0)
        return y

    B = x.shape[0]
    m = transform["matrix_size"]

    t = pt_mlp(x, transform["lnet"])
    t = jnp.max(t, axis=1)
    t = f32_mlp(t, transform["gnet"])
    w_fc, b_fc = transform["fc"]
    T = (_mm(t, w_fc) + b_fc).reshape(B, m, m)

    (w1, b1, r1) = extraction["blocks"][0]
    w1_eff = q(jnp.einsum("bij,jk->bik", T, w1, precision=HIGH))
    h = jnp.einsum("bnc,bck->bnk", q(x), w1_eff, precision=HIGH) + b1
    if r1:
        h = jnp.maximum(h, 0.0)
    for (w, b, r) in extraction["blocks"][1:]:
        h = _mm(q(h), q(w)) + b
        if r:
            h = jnp.maximum(h, 0.0)
    g = jnp.max(h, axis=1)
    y = f32_mlp(g, classification["blocks"])
    return y, [T]


if __name__ == "__main__":
    key = jax.random.PRNGKey(0)
    k_params, k_x = jax.random.split(key)

    params = build_params(k_params)

    # Small point cloud: batch=2, points=16, channels=4
    x = jax.random.normal(k_x, (2, 16, 4), jnp.float32)

    fwd = jax.jit(lambda xx: pointnet_forward(xx, params))
    y, ws = fwd(x)
    y = jax.block_until_ready(y)
    T = jax.block_until_ready(ws[0])

    assert y.shape == (2, 10)
    assert T.shape == (2, 4, 4)

    # Tight check against the bf16-aware reference (same quantization points):
    # validates the fused kernel logic, the bmm fold and the online max.
    y_q, ws_q = _reference_forward_bf16(x, params)
    assert jnp.allclose(y, y_q, rtol=1e-2, atol=1e-2)
    assert jnp.allclose(T, ws_q[0], rtol=1e-2, atol=1e-2)

    # Looser check against the exact f32 module semantics (bf16 per-point
    # matmuls introduce ~0.5-2% quantization error by design).
    y_ref, ws_ref = _reference_forward(x, params)
    assert jnp.allclose(T, ws_ref[0], rtol=2e-2, atol=2e-2)
    assert jnp.allclose(y, y_ref, rtol=5e-2, atol=5e-2)

    print("KERNEL_OK")
</pallas_src>

<mosaic_0001>
module attributes {stable_mosaic.version = 11 : i64} {
  func.func @kernel(%arg0: i32, %arg1: i32, %arg2: memref<1x16x8xbf16, #tpu.memory_space<vmem>>, %arg3: memref<8x128xbf16, #tpu.memory_space<vmem>>, %arg4: memref<1x128xf32, #tpu.memory_space<vmem>>, %arg5: memref<128x128xbf16, #tpu.memory_space<vmem>>, %arg6: memref<1x128xf32, #tpu.memory_space<vmem>>, %arg7: memref<128x128xf32, #tpu.memory_space<vmem>>, %arg8: memref<1x128xf32, #tpu.memory_space<vmem>>, %arg9: memref<128x128xf32, #tpu.memory_space<vmem>>, %arg10: memref<1x128xf32, #tpu.memory_space<vmem>>, %arg11: memref<1x8x128xf32, #tpu.memory_space<vmem>>, %arg12: memref<8x128xf32, #tpu.memory_space<vmem>>) attributes {dimension_semantics = [#tpu.dimension_semantics<parallel>, #tpu.dimension_semantics<arbitrary>], iteration_bounds = array<i64: 2, 1>, scalar_prefetch = 0 : i64, scratch_operands = 1 : i64, tpu.core_type = #tpu.core_type<tc>, window_params = [{transform_indices = @transform_0, window_bounds = array<i64: 1, 16, 8>}, {pipeline_mode = #tpu.pipeline_mode<synchronous>, transform_indices = @transform_1, window_bounds = array<i64: 8, 128>}, {pipeline_mode = #tpu.pipeline_mode<synchronous>, transform_indices = @transform_2, window_bounds = array<i64: 1, 128>}, {pipeline_mode = #tpu.pipeline_mode<synchronous>, transform_indices = @transform_3, window_bounds = array<i64: 128, 128>}, {pipeline_mode = #tpu.pipeline_mode<synchronous>, transform_indices = @transform_4, window_bounds = array<i64: 1, 128>}, {pipeline_mode = #tpu.pipeline_mode<synchronous>, transform_indices = @transform_5, window_bounds = array<i64: 128, 128>}, {pipeline_mode = #tpu.pipeline_mode<synchronous>, transform_indices = @transform_6, window_bounds = array<i64: 1, 128>}, {pipeline_mode = #tpu.pipeline_mode<synchronous>, transform_indices = @transform_7, window_bounds = array<i64: 128, 128>}, {pipeline_mode = #tpu.pipeline_mode<synchronous>, transform_indices = @transform_8, window_bounds = array<i64: 1, 128>}, {transform_indices = @transform_9, window_bounds = array<i64: 1, 8, 128>}]} {
    %c0_i32 = arith.constant 0 : i32
    %0 = arith.cmpi eq, %arg1, %c0_i32 : i32
    %1 = arith.extui %0 : i1 to i32
    %c0_i32_0 = arith.constant 0 : i32
    %2 = arith.cmpi ne, %1, %c0_i32_0 : i32
    scf.if %2 {
      %cst_21 = arith.constant -3.40282347E+38 : f32
      %29 = vector.broadcast %cst_21 : f32 to vector<8x128xf32>
      %c0_22 = arith.constant 0 : index
      %c0_23 = arith.constant 0 : index
      %30 = vector.load %arg12[%c0_22, %c0_23] : memref<8x128xf32, #tpu.memory_space<vmem>>, vector<8x128xf32>
      tpu.vector_store %arg12[%c0_22, %c0_23], %29 {strides = array<i32>} : memref<8x128xf32, #tpu.memory_space<vmem>>, vector<8x128xf32>,
    } else {
    }
    %c0 = arith.constant 0 : index
    %c0_1 = arith.constant 0 : index
    %c0_2 = arith.constant 0 : index
    %3 = vector.load %arg2[%c0, %c0_1, %c0_2] : memref<1x16x8xbf16, #tpu.memory_space<vmem>>, vector<1x16x8xbf16>
    %4 = vector.shape_cast %3 : vector<1x16x8xbf16> to vector<16x8xbf16>
    %c0_3 = arith.constant 0 : index
    %c0_4 = arith.constant 0 : index
    %5 = vector.load %arg3[%c0_3, %c0_4] : memref<8x128xbf16, #tpu.memory_space<vmem>>, vector<8x128xbf16>
    %cst = arith.constant dense<0.000000e+00> : vector<16x128xf32>
    %6 = tpu.matmul %4, %5, %cst {dimension_numbers = #tpu.dot_dimension_numbers<[1], [0], [0], [1], [0, 0, 1, 1], [], []>} : vector<16x8xbf16>, vector<8x128xbf16>, vector<16x128xf32> -> vector<16x128xf32>
    %c0_5 = arith.constant 0 : index
    %c0_6 = arith.constant 0 : index
    %7 = vector.load %arg4[%c0_5, %c0_6] : memref<1x128xf32, #tpu.memory_space<vmem>>, vector<1x128xf32>
    %8 = vector.broadcast %7 : vector<1x128xf32> to vector<16x128xf32>
    %9 = arith.addf %6, %8 : vector<16x128xf32>
    %cst_7 = arith.constant 0.000000e+00 : f32
    %10 = vector.broadcast %cst_7 : f32 to vector<16x128xf32>
    %11 = arith.maximumf %9, %10 : vector<16x128xf32>
    %12 = arith.truncf %11 : vector<16x128xf32> to vector<16x128xbf16>
    %c0_8 = arith.constant 0 : index
    %c0_9 = arith.constant 0 : index
    %13 = vector.load %arg5[%c0_8, %c0_9] : memref<128x128xbf16, #tpu.memory_space<vmem>>, vector<128x128xbf16>
    %cst_10 = arith.constant dense<0.000000e+00> : vector<16x128xf32>
    %14 = tpu.matmul %12, %13, %cst_10 {dimension_numbers = #tpu.dot_dimension_numbers<[1], [0], [0], [1], [0, 0, 1, 1], [], []>} : vector<16x128xbf16>, vector<128x128xbf16>, vector<16x128xf32> -> vector<16x128xf32>
    %c0_11 = arith.constant 0 : index
    %c0_12 = arith.constant 0 : index
    %15 = vector.load %arg6[%c0_11, %c0_12] : memref<1x128xf32, #tpu.memory_space<vmem>>, vector<1x128xf32>
    %16 = vector.broadcast %15 : vector<1x128xf32> to vector<16x128xf32>
    %17 = arith.addf %14, %16 : vector<16x128xf32>
    %cst_13 = arith.constant 0.000000e+00 : f32
    %18 = vector.broadcast %cst_13 : f32 to vector<16x128xf32>
    %19 = arith.maximumf %17, %18 : vector<16x128xf32>
    %cst_14 = arith.constant dense<0xFF800000> : vector<128xf32>
    %20 = vector.multi_reduction <maximumf>, %19, %cst_14 [0] : vector<16x128xf32> to vector<128xf32>
    %21 = vector.shape_cast %20 : vector<128xf32> to vector<1x128xf32>
    %c0_15 = arith.constant 0 : index
    %c0_16 = arith.constant 0 : index
    %22 = vector.load %arg12[%c0_15, %c0_16] : memref<8x128xf32, #tpu.memory_space<vmem>>, vector<8x128xf32>
    %23 = vector.broadcast %21 : vector<1x128xf32> to vector<8x128xf32>
    %24 = arith.maximumf %22, %23 : vector<8x128xf32>
    %c0_17 = arith.constant 0 : index
    %c0_18 = arith.constant 0 : index
    %25 = vector.load %arg12[%c0_17, %c0_18] : memref<8x128xf32, #tpu.memory_space<vmem>>, vector<8x128xf32>
    tpu.vector_store %arg12[%c0_17, %c0_18], %24 {strides = array<i32>} : memref<8x128xf32, #tpu.memory_space<vmem>>, vector<8x128xf32>,
    %c0_i32_19 = arith.constant 0 : i32
    %26 = arith.cmpi eq, %arg1, %c0_i32_19 : i32
    %27 = arith.extui %26 : i1 to i32
    %c0_i32_20 = arith.constant 0 : i32
    %28 = arith.cmpi ne, %27, %c0_i32_20 : i32
    scf.if %28 {
      %c0_21 = arith.constant 0 : index
      %c0_22 = arith.constant 0 : index
      %29 = vector.load %arg12[%c0_21, %c0_22] : memref<8x128xf32, #tpu.memory_space<vmem>>, vector<8x128xf32>
      %c0_23 = arith.constant 0 : index
      %c0_24 = arith.constant 0 : index
      %30 = vector.load %arg7[%c0_23, %c0_24] : memref<128x128xf32, #tpu.memory_space<vmem>>, vector<128x128xf32>
      %cst_25 = arith.constant dense<0.000000e+00> : vector<8x128xf32>
      %31 = tpu.matmul %29, %30, %cst_25 {dimension_numbers = #tpu.dot_dimension_numbers<[1], [0], [0], [1], [0, 0, 1, 1], [], []>} : vector<8x128xf32>, vector<128x128xf32>, vector<8x128xf32> -> vector<8x128xf32>
      %c0_26 = arith.constant 0 : index
      %c0_27 = arith.constant 0 : index
      %32 = vector.load %arg8[%c0_26, %c0_27] : memref<1x128xf32, #tpu.memory_space<vmem>>, vector<1x128xf32>
      %33 = vector.broadcast %32 : vector<1x128xf32> to vector<8x128xf32>
      %34 = arith.addf %31, %33 : vector<8x128xf32>
      %cst_28 = arith.constant 0.000000e+00 : f32
      %35 = vector.broadcast %cst_28 : f32 to vector<8x128xf32>
      %36 = arith.maximumf %34, %35 : vector<8x128xf32>
      %c0_29 = arith.constant 0 : index
      %c0_30 = arith.constant 0 : index
      %37 = vector.load %arg9[%c0_29, %c0_30] : memref<128x128xf32, #tpu.memory_space<vmem>>, vector<128x128xf32>
      %cst_31 = arith.constant dense<0.000000e+00> : vector<8x128xf32>
      %38 = tpu.matmul %36, %37, %cst_31 {dimension_numbers = #tpu.dot_dimension_numbers<[1], [0], [0], [1], [0, 0, 1, 1], [], []>} : vector<8x128xf32>, vector<128x128xf32>, vector<8x128xf32> -> vector<8x128xf32>
      %c0_32 = arith.constant 0 : index
      %c0_33 = arith.constant 0 : index
      %39 = vector.load %arg10[%c0_32, %c0_33] : memref<1x128xf32, #tpu.memory_space<vmem>>, vector<1x128xf32>
      %40 = vector.broadcast %39 : vector<1x128xf32> to vector<8x128xf32>
      %41 = arith.addf %38, %40 : vector<8x128xf32>
      %42 = vector.shape_cast %41 : vector<8x128xf32> to vector<1x8x128xf32>
      %c0_34 = arith.constant 0 : index
      %c0_35 = arith.constant 0 : index
      %c0_36 = arith.constant 0 : index
      %43 = vector.load %arg11[%c0_34, %c0_35, %c0_36] : memref<1x8x128xf32, #tpu.memory_space<vmem>>, vector<1x8x128xf32>
      tpu.vector_store %arg11[%c0_34, %c0_35, %c0_36], %42 {strides = array<i32>} : memref<1x8x128xf32, #tpu.memory_space<vmem>>, vector<1x8x128xf32>,
    } else {
    }
    return
  }
  func.func @transform_0(%arg0: i32, %arg1: i32) -> (i32, i32, i32) {
    %c0_i32 = arith.constant 0 : i32
    %c0_i32_0 = arith.constant 0 : i32
    return %arg0, %arg1, %c0_i32 : i32, i32, i32
  }
  func.func @transform_1(%arg0: i32, %arg1: i32) -> (i32, i32) {
    %c0_i32 = arith.constant 0 : i32
    %c0_i32_0 = arith.constant 0 : i32
    %c0_i32_1 = arith.constant 0 : i32
    return %c0_i32, %c0_i32_0 : i32, i32
  }
  func.func @transform_2(%arg0: i32, %arg1: i32) -> (i32, i32) {
    %c0_i32 = arith.constant 0 : i32
    %c0_i32_0 = arith.constant 0 : i32
    %c0_i32_1 = arith.constant 0 : i32
    return %c0_i32, %c0_i32_0 : i32, i32
  }
  func.func @transform_3(%arg0: i32, %arg1: i32) -> (i32, i32) {
    %c0_i32 = arith.constant 0 : i32
    %c0_i32_0 = arith.constant 0 : i32
    %c0_i32_1 = arith.constant 0 : i32
    return %c0_i32, %c0_i32_0 : i32, i32
  }
  func.func @transform_4(%arg0: i32, %arg1: i32) -> (i32, i32) {
    %c0_i32 = arith.constant 0 : i32
    %c0_i32_0 = arith.constant 0 : i32
    %c0_i32_1 = arith.constant 0 : i32
    return %c0_i32, %c0_i32_0 : i32, i32
  }
  func.func @transform_5(%arg0: i32, %arg1: i32) -> (i32, i32) {
    %c0_i32 = arith.constant 0 : i32
    %c0_i32_0 = arith.constant 0 : i32
    %c0_i32_1 = arith.constant 0 : i32
    return %c0_i32, %c0_i32_0 : i32, i32
  }
  func.func @transform_6(%arg0: i32, %arg1: i32) -> (i32, i32) {
    %c0_i32 = arith.constant 0 : i32
    %c0_i32_0 = arith.constant 0 : i32
    %c0_i32_1 = arith.constant 0 : i32
    return %c0_i32, %c0_i32_0 : i32, i32
  }
  func.func @transform_7(%arg0: i32, %arg1: i32) -> (i32, i32) {
    %c0_i32 = arith.constant 0 : i32
    %c0_i32_0 = arith.constant 0 : i32
    %c0_i32_1 = arith.constant 0 : i32
    return %c0_i32, %c0_i32_0 : i32, i32
  }
  func.func @transform_8(%arg0: i32, %arg1: i32) -> (i32, i32) {
    %c0_i32 = arith.constant 0 : i32
    %c0_i32_0 = arith.constant 0 : i32
    %c0_i32_1 = arith.constant 0 : i32
    return %c0_i32, %c0_i32_0 : i32, i32
  }
  func.func @transform_9(%arg0: i32, %arg1: i32) -> (i32, i32, i32) {
    %c0_i32 = arith.constant 0 : i32
    %c0_i32_0 = arith.constant 0 : i32
    %c0_i32_1 = arith.constant 0 : i32
    return %arg0, %c0_i32, %c0_i32_0 : i32, i32, i32
  }
}

module attributes {stable_mosaic.version = 11 : i64} {
  func.func @kernel(%arg0: i32, %arg1: i32, %arg2: memref<1x16x8xbf16, #tpu.memory_space<vmem>>, %arg3: memref<1x8x128xbf16, #tpu.memory_space<vmem>>, %arg4: memref<1x128xf32, #tpu.memory_space<vmem>>, %arg5: memref<128x128xbf16, #tpu.memory_space<vmem>>, %arg6: memref<1x128xf32, #tpu.memory_space<vmem>>, %arg7: memref<128x128xf32, #tpu.memory_space<vmem>>, %arg8: memref<1x128xf32, #tpu.memory_space<vmem>>, %arg9: memref<128x128xf32, #tpu.memory_space<vmem>>, %arg10: memref<1x128xf32, #tpu.memory_space<vmem>>, %arg11: memref<1x8x128xf32, #tpu.memory_space<vmem>>, %arg12: memref<8x128xf32, #tpu.memory_space<vmem>>) attributes {dimension_semantics = [#tpu.dimension_semantics<parallel>, #tpu.dimension_semantics<arbitrary>], iteration_bounds = array<i64: 2, 1>, scalar_prefetch = 0 : i64, scratch_operands = 1 : i64, tpu.core_type = #tpu.core_type<tc>, window_params = [{transform_indices = @transform_0, window_bounds = array<i64: 1, 16, 8>}, {transform_indices = @transform_1, window_bounds = array<i64: 1, 8, 128>}, {pipeline_mode = #tpu.pipeline_mode<synchronous>, transform_indices = @transform_2, window_bounds = array<i64: 1, 128>}, {pipeline_mode = #tpu.pipeline_mode<synchronous>, transform_indices = @transform_3, window_bounds = array<i64: 128, 128>}, {pipeline_mode = #tpu.pipeline_mode<synchronous>, transform_indices = @transform_4, window_bounds = array<i64: 1, 128>}, {pipeline_mode = #tpu.pipeline_mode<synchronous>, transform_indices = @transform_5, window_bounds = array<i64: 128, 128>}, {pipeline_mode = #tpu.pipeline_mode<synchronous>, transform_indices = @transform_6, window_bounds = array<i64: 1, 128>}, {pipeline_mode = #tpu.pipeline_mode<synchronous>, transform_indices = @transform_7, window_bounds = array<i64: 128, 128>}, {pipeline_mode = #tpu.pipeline_mode<synchronous>, transform_indices = @transform_8, window_bounds = array<i64: 1, 128>}, {transform_indices = @transform_9, window_bounds = array<i64: 1, 8, 128>}]} {
    %c0_i32 = arith.constant 0 : i32
    %0 = arith.cmpi eq, %arg1, %c0_i32 : i32
    %1 = arith.extui %0 : i1 to i32
    %c0_i32_0 = arith.constant 0 : i32
    %2 = arith.cmpi ne, %1, %c0_i32_0 : i32
    scf.if %2 {
      %cst_22 = arith.constant -3.40282347E+38 : f32
      %30 = vector.broadcast %cst_22 : f32 to vector<8x128xf32>
      %c0_23 = arith.constant 0 : index
      %c0_24 = arith.constant 0 : index
      %31 = vector.load %arg12[%c0_23, %c0_24] : memref<8x128xf32, #tpu.memory_space<vmem>>, vector<8x128xf32>
      tpu.vector_store %arg12[%c0_23, %c0_24], %30 {strides = array<i32>} : memref<8x128xf32, #tpu.memory_space<vmem>>, vector<8x128xf32>,
    } else {
    }
    %c0 = arith.constant 0 : index
    %c0_1 = arith.constant 0 : index
    %c0_2 = arith.constant 0 : index
    %3 = vector.load %arg2[%c0, %c0_1, %c0_2] : memref<1x16x8xbf16, #tpu.memory_space<vmem>>, vector<1x16x8xbf16>
    %4 = vector.shape_cast %3 : vector<1x16x8xbf16> to vector<16x8xbf16>
    %c0_3 = arith.constant 0 : index
    %c0_4 = arith.constant 0 : index
    %c0_5 = arith.constant 0 : index
    %5 = vector.load %arg3[%c0_3, %c0_4, %c0_5] : memref<1x8x128xbf16, #tpu.memory_space<vmem>>, vector<1x8x128xbf16>
    %6 = vector.shape_cast %5 : vector<1x8x128xbf16> to vector<8x128xbf16>
    %cst = arith.constant dense<0.000000e+00> : vector<16x128xf32>
    %7 = tpu.matmul %4, %6, %cst {dimension_numbers = #tpu.dot_dimension_numbers<[1], [0], [0], [1], [0, 0, 1, 1], [], []>} : vector<16x8xbf16>, vector<8x128xbf16>, vector<16x128xf32> -> vector<16x128xf32>
    %c0_6 = arith.constant 0 : index
    %c0_7 = arith.constant 0 : index
    %8 = vector.load %arg4[%c0_6, %c0_7] : memref<1x128xf32, #tpu.memory_space<vmem>>, vector<1x128xf32>
    %9 = vector.broadcast %8 : vector<1x128xf32> to vector<16x128xf32>
    %10 = arith.addf %7, %9 : vector<16x128xf32>
    %cst_8 = arith.constant 0.000000e+00 : f32
    %11 = vector.broadcast %cst_8 : f32 to vector<16x128xf32>
    %12 = arith.maximumf %10, %11 : vector<16x128xf32>
    %13 = arith.truncf %12 : vector<16x128xf32> to vector<16x128xbf16>
    %c0_9 = arith.constant 0 : index
    %c0_10 = arith.constant 0 : index
    %14 = vector.load %arg5[%c0_9, %c0_10] : memref<128x128xbf16, #tpu.memory_space<vmem>>, vector<128x128xbf16>
    %cst_11 = arith.constant dense<0.000000e+00> : vector<16x128xf32>
    %15 = tpu.matmul %13, %14, %cst_11 {dimension_numbers = #tpu.dot_dimension_numbers<[1], [0], [0], [1], [0, 0, 1, 1], [], []>} : vector<16x128xbf16>, vector<128x128xbf16>, vector<16x128xf32> -> vector<16x128xf32>
    %c0_12 = arith.constant 0 : index
    %c0_13 = arith.constant 0 : index
    %16 = vector.load %arg6[%c0_12, %c0_13] : memref<1x128xf32, #tpu.memory_space<vmem>>, vector<1x128xf32>
    %17 = vector.broadcast %16 : vector<1x128xf32> to vector<16x128xf32>
    %18 = arith.addf %15, %17 : vector<16x128xf32>
    %cst_14 = arith.constant 0.000000e+00 : f32
    %19 = vector.broadcast %cst_14 : f32 to vector<16x128xf32>
    %20 = arith.maximumf %18, %19 : vector<16x128xf32>
    %cst_15 = arith.constant dense<0xFF800000> : vector<128xf32>
    %21 = vector.multi_reduction <maximumf>, %20, %cst_15 [0] : vector<16x128xf32> to vector<128xf32>
    %22 = vector.shape_cast %21 : vector<128xf32> to vector<1x128xf32>
    %c0_16 = arith.constant 0 : index
    %c0_17 = arith.constant 0 : index
    %23 = vector.load %arg12[%c0_16, %c0_17] : memref<8x128xf32, #tpu.memory_space<vmem>>, vector<8x128xf32>
    %24 = vector.broadcast %22 : vector<1x128xf32> to vector<8x128xf32>
    %25 = arith.maximumf %23, %24 : vector<8x128xf32>
    %c0_18 = arith.constant 0 : index
    %c0_19 = arith.constant 0 : index
    %26 = vector.load %arg12[%c0_18, %c0_19] : memref<8x128xf32, #tpu.memory_space<vmem>>, vector<8x128xf32>
    tpu.vector_store %arg12[%c0_18, %c0_19], %25 {strides = array<i32>} : memref<8x128xf32, #tpu.memory_space<vmem>>, vector<8x128xf32>,
    %c0_i32_20 = arith.constant 0 : i32
    %27 = arith.cmpi eq, %arg1, %c0_i32_20 : i32
    %28 = arith.extui %27 : i1 to i32
    %c0_i32_21 = arith.constant 0 : i32
    %29 = arith.cmpi ne, %28, %c0_i32_21 : i32
    scf.if %29 {
      %c0_22 = arith.constant 0 : index
      %c0_23 = arith.constant 0 : index
      %30 = vector.load %arg12[%c0_22, %c0_23] : memref<8x128xf32, #tpu.memory_space<vmem>>, vector<8x128xf32>
      %c0_24 = arith.constant 0 : index
      %c0_25 = arith.constant 0 : index
      %31 = vector.load %arg7[%c0_24, %c0_25] : memref<128x128xf32, #tpu.memory_space<vmem>>, vector<128x128xf32>
      %cst_26 = arith.constant dense<0.000000e+00> : vector<8x128xf32>
      %32 = tpu.matmul %30, %31, %cst_26 {dimension_numbers = #tpu.dot_dimension_numbers<[1], [0], [0], [1], [0, 0, 1, 1], [], []>} : vector<8x128xf32>, vector<128x128xf32>, vector<8x128xf32> -> vector<8x128xf32>
      %c0_27 = arith.constant 0 : index
      %c0_28 = arith.constant 0 : index
      %33 = vector.load %arg8[%c0_27, %c0_28] : memref<1x128xf32, #tpu.memory_space<vmem>>, vector<1x128xf32>
      %34 = vector.broadcast %33 : vector<1x128xf32> to vector<8x128xf32>
      %35 = arith.addf %32, %34 : vector<8x128xf32>
      %cst_29 = arith.constant 0.000000e+00 : f32
      %36 = vector.broadcast %cst_29 : f32 to vector<8x128xf32>
      %37 = arith.maximumf %35, %36 : vector<8x128xf32>
      %c0_30 = arith.constant 0 : index
      %c0_31 = arith.constant 0 : index
      %38 = vector.load %arg9[%c0_30, %c0_31] : memref<128x128xf32, #tpu.memory_space<vmem>>, vector<128x128xf32>
      %cst_32 = arith.constant dense<0.000000e+00> : vector<8x128xf32>
      %39 = tpu.matmul %37, %38, %cst_32 {dimension_numbers = #tpu.dot_dimension_numbers<[1], [0], [0], [1], [0, 0, 1, 1], [], []>} : vector<8x128xf32>, vector<128x128xf32>, vector<8x128xf32> -> vector<8x128xf32>
      %c0_33 = arith.constant 0 : index
      %c0_34 = arith.constant 0 : index
      %40 = vector.load %arg10[%c0_33, %c0_34] : memref<1x128xf32, #tpu.memory_space<vmem>>, vector<1x128xf32>
      %41 = vector.broadcast %40 : vector<1x128xf32> to vector<8x128xf32>
      %42 = arith.addf %39, %41 : vector<8x128xf32>
      %43 = vector.shape_cast %42 : vector<8x128xf32> to vector<1x8x128xf32>
      %c0_35 = arith.constant 0 : index
      %c0_36 = arith.constant 0 : index
      %c0_37 = arith.constant 0 : index
      %44 = vector.load %arg11[%c0_35, %c0_36, %c0_37] : memref<1x8x128xf32, #tpu.memory_space<vmem>>, vector<1x8x128xf32>
      tpu.vector_store %arg11[%c0_35, %c0_36, %c0_37], %43 {strides = array<i32>} : memref<1x8x128xf32, #tpu.memory_space<vmem>>, vector<1x8x128xf32>,
    } else {
    }
    return
  }
  func.func @transform_0(%arg0: i32, %arg1: i32) -> (i32, i32, i32) {
    %c0_i32 = arith.constant 0 : i32
    %c0_i32_0 = arith.constant 0 : i32
    return %arg0, %arg1, %c0_i32 : i32, i32, i32
  }
  func.func @transform_1(%arg0: i32, %arg1: i32) -> (i32, i32, i32) {
    %c0_i32 = arith.constant 0 : i32
    %c0_i32_0 = arith.constant 0 : i32
    %c0_i32_1 = arith.constant 0 : i32
    return %arg0, %c0_i32, %c0_i32_0 : i32, i32, i32
  }
  func.func @transform_2(%arg0: i32, %arg1: i32) -> (i32, i32) {
    %c0_i32 = arith.constant 0 : i32
    %c0_i32_0 = arith.constant 0 : i32
    %c0_i32_1 = arith.constant 0 : i32
    return %c0_i32, %c0_i32_0 : i32, i32
  }
  func.func @transform_3(%arg0: i32, %arg1: i32) -> (i32, i32) {
    %c0_i32 = arith.constant 0 : i32
    %c0_i32_0 = arith.constant 0 : i32
    %c0_i32_1 = arith.constant 0 : i32
    return %c0_i32, %c0_i32_0 : i32, i32
  }
  func.func @transform_4(%arg0: i32, %arg1: i32) -> (i32, i32) {
    %c0_i32 = arith.constant 0 : i32
    %c0_i32_0 = arith.constant 0 : i32
    %c0_i32_1 = arith.constant 0 : i32
    return %c0_i32, %c0_i32_0 : i32, i32
  }
  func.func @transform_5(%arg0: i32, %arg1: i32) -> (i32, i32) {
    %c0_i32 = arith.constant 0 : i32
    %c0_i32_0 = arith.constant 0 : i32
    %c0_i32_1 = arith.constant 0 : i32
    return %c0_i32, %c0_i32_0 : i32, i32
  }
  func.func @transform_6(%arg0: i32, %arg1: i32) -> (i32, i32) {
    %c0_i32 = arith.constant 0 : i32
    %c0_i32_0 = arith.constant 0 : i32
    %c0_i32_1 = arith.constant 0 : i32
    return %c0_i32, %c0_i32_0 : i32, i32
  }
  func.func @transform_7(%arg0: i32, %arg1: i32) -> (i32, i32) {
    %c0_i32 = arith.constant 0 : i32
    %c0_i32_0 = arith.constant 0 : i32
    %c0_i32_1 = arith.constant 0 : i32
    return %c0_i32, %c0_i32_0 : i32, i32
  }
  func.func @transform_8(%arg0: i32, %arg1: i32) -> (i32, i32) {
    %c0_i32 = arith.constant 0 : i32
    %c0_i32_0 = arith.constant 0 : i32
    %c0_i32_1 = arith.constant 0 : i32
    return %c0_i32, %c0_i32_0 : i32, i32
  }
  func.func @transform_9(%arg0: i32, %arg1: i32) -> (i32, i32, i32) {
    %c0_i32 = arith.constant 0 : i32
    %c0_i32_0 = arith.constant 0 : i32
    %c0_i32_1 = arith.constant 0 : i32
    return %arg0, %c0_i32, %c0_i32_0 : i32, i32, i32
  }
}

</mosaic_0001>

<bundles_post_ra>
// kernel: _lambda_.2
= control target key start
LH: loop header
LB: loop body
LE: loop exit
PB: predicated region body
PF: predicated region fallthrough
CT: control target
= control target key end

     0   :  { %14 = vsyncpa [#allocation4], 0  ;;  %s1441_s0 = inlined_call_operand.vmem [shape: bf16[2,16,8], index: 0, kind: input, shape index: {}]   ;;  %s1442_s1 = inlined_call_operand.vmem [shape: bf16[8,128], index: 1, kind: input, shape index: {}]   ;;  %s1443_s2 = inlined_call_operand.vmem [shape: f32[1,128], index: 2, kind: input, shape index: {}]   ;;  %s1444_s3 = inlined_call_operand.hbm [shape: bf16[128,128], index: 3, kind: input, shape index: {}]   ;;  %s1445_s4 = inlined_call_operand.vmem [shape: f32[1,128], index: 4, kind: input, shape index: {}]   ;;  %s1446_s5 = inlined_call_operand.hbm [shape: f32[128,128], index: 5, kind: input, shape index: {}]   ;;  %s1447_s6 = inlined_call_operand.vmem [shape: f32[1,128], index: 6, kind: input, shape index: {}]   ;;  %s1448_s7 = inlined_call_operand.vmem [shape: f32[128,128], index: 7, kind: input, shape index: {}]   ;;  %s1449_s8 = inlined_call_operand.vmem [shape: f32[1,128], index: 8, kind: input, shape index: {}]   ;;  %s1450_s9 = inlined_call_operand.vmem [shape: f32[2,8,128], index: 9, kind: output, shape index: {}]  }
   0x1   :  { %15 = vsyncpa [#allocation6], 0  ;;  %s1240_s30 = smov 0   ;;  %s1242_s10 = smov 0  }
   0x2   :  { %s1244_s11 = smov 0  }
   0x3 LB: > { %s868_s12 = sadd.s32 4294967295, %s1180_s11   ;;  %s33_s13 = sadd.s32 1, %s1176_s10  ;;  %s1180_s11 = sphi %s1244_s11, %s21_s11   ;;  %s1176_s10 = sphi %s1242_s10, %s1455_s10   ;;  %s1172_s30 = sphi %s1240_s30, %s1454_s30  }
   0x4   : > { %p35_p0 = scmp.ge.s32.totalorder %s33_s13, 2  ;;  %p870_p1 = scmp.ge.s32.totalorder %s1180_s11, 1 }
   0x5   : > { %p260_p2 = scmp.lt.s32.totalorder %s1180_s11, 3  ;;  %p1265_p4 = scmp.eq.s32.totalorder %s868_s12, 0 }
   0x6   : > { %s1457_s13 = smov (%p35_p0, %s33_s13), 0  ;;  %s1182_s16 = smov [#allocation3]  }
   0x7   : > { %p1261_p3 = pnand %p870_p1, %p260_p2  ;;  %s278_s17 = sshll.u32 %s1182_s16, 4  ;;  %s279_s17 = int_to_ptr.vmem [resolvable:$true] %s278_s17 }
   0x8   : > { %s1183_s19 = smov [#allocation5]   ;;  %s1109_s21 = scalar_lea.vmem %s279_s17, 1024 }
   0x9   : > { %p1046_p5 = pneg %p1261_p3  ;;  %s294_s20 = sshll.u32 %s1183_s19, 4  ;;  %s295_s20 = int_to_ptr.vmem [resolvable:$true] %s294_s20 }
   0xa   : > { %p1110_p8 = scmp.ne.s32.totalorder %s279_s17, %s1109_s21  ;;  %p1117_p11 = scmp.lt.s32.totalorder %s279_s17, %s279_s17 }
   0xb   : > { %p1273_p6 = pnand %p1265_p4, %p1046_p5  ;;  %p1118_p12 = scmp.lt.s32.totalorder %s1109_s21, %s1109_s21 }
   0xd   : > { %p1100_p7 = pneg %p1273_p6  ;;  %p1119_p13 = por %p1118_p12, %p1117_p11 }
   0xf   : > { %p1112_p9 = pnand %p1110_p8, %p1100_p7 }
  0x11   : > { %p1113_p10 = pneg %p1112_p9 }
  0x13   : > { %p1120_p0 = pnand %p1119_p13, %p1113_p10 }
  0x15   : > { %1123 = shalt.err (!%p1120_p0)
}
  0x16   : > { %s1184_s22 = smov 64   ;;  %s1185_s23 = smov 4  }
  0x17   : > { %1049 = dma.hbm_to_vmem [thread:$0]  (!%p1273_p6), %s1444_s3, 1024, %s279_s17, [#allocation4], %s1184_s22, %s1184_s22, %s1185_s23  }
  0x18   : > { %s1135_s26 = scalar_lea.vmem %s295_s20, 2048  ;;  %p1143_p8 = scmp.lt.s32.totalorder %s295_s20, %s295_s20 }
  0x19   : > { %p1136_p1 = scmp.ne.s32.totalorder %s295_s20, %s1135_s26  ;;  %p1144_p9 = scmp.lt.s32.totalorder %s1135_s26, %s1135_s26 }
  0x1b   : > { %p1138_p2 = pnand %p1136_p1, %p1100_p7  ;;  %p1145_p11 = por %p1144_p9, %p1143_p8 }
  0x1d   : > { %p1139_p5 = pneg %p1138_p2 }
  0x1f   : > { %p1146_p10 = pnand %p1145_p11, %p1139_p5 }
  0x21   : > { %1149 = shalt.err (!%p1146_p10)
}
  0x22   : > { %s1186_s27 = smov 128   ;;  %s1187_s28 = smov 8  }
  0x23   : > { %1052 = dma.hbm_to_vmem [thread:$0]  (!%p1273_p6), %s1446_s5, 2048, %s295_s20, [#allocation6], %s1186_s27, %s1186_s27, %s1187_s28  }
  0x24   : > { %332 = sbr.rel (%p1261_p3) target bundleno = 863 (0x35f), region = 56 }
  0x29   : > { %1163 = dma.done.wait (%p1265_p4), [#allocation4], 1024  }
  0x2a   : > { %1165 = vsyncadd (%p1265_p4), [#allocation4], 4294966272 }
  0x2b   : > { %1167 = dma.done.wait (%p1265_p4), [#allocation6], 2048  }
  0x2c   : > { %1169 = vsyncadd (%p1265_p4), [#allocation6], 4294965248  ;;  %p376_p7 = scmp.lt.s32.totalorder %s1172_s30, 1  ;;  %v1188_v0 = vmov 0.0   ;;  %vm1189_vm0 = vmmov 0   ;;  %vm414_vm1 = vcmask 1043456  }
  0x2d   : > { %942 = vmatprep.subr.bf16.mxu0 %v1188_v0  ;;  %944 = vmatprep.mubr.msk.bf16.mxu0 %vm1189_vm0, %v1188_v0  ;;  %v397_v1 = vld [vmem:[%s1442_s1] sm:$0xf]  ;;  %vm410_vm2 = vcmask 64512   ;;  %v1090_v4 = vld [vmem:[#allocation3 + $0x38] sm:$0xff]   ;;  %v1091_v5 = vld [vmem:[#allocation3 + $0x30] sm:$0xff]  }
  0x2e   : > { %s1459_s30 = smov (!%p376_p7, %s1172_s30), 1  ;;  %948 = vmatprep.subr.bf16.mxu1 %v1188_v0  ;;  %964 = vmatprep.mubr.msk.bf16.mxu1 %vm1189_vm0, %v1188_v0  ;;  %v416_v2 = vsel %vm414_vm1, %v397_v1, 0  ;;  %v1092_v6 = vld [vmem:[#allocation3 + $0x28] sm:$0xff]   ;;  %v1093_v7 = vld [vmem:[#allocation3 + $0x20] sm:$0xff]   ;;  %v1094_v8 = vld [vmem:[#allocation3 + $0x18] sm:$0xff]  }
  0x2f   : > { %s896_s14 = sshll.u32 %s1459_s30, 3  ;;  %943 = vmatpush3.bf16.msra.mxu0 %v416_v2  ;;  %949 = vmatpush3.bf16.msra.mxu1 %v1090_v4  ;;  %v1095_v9 = vld [vmem:[#allocation3 + $0x10] sm:$0xff]   ;;  %v1096_v10 = vld [vmem:[#allocation3 + $0x8] sm:$0xff]   ;;  %v1097_v11 = vld [vmem:[#allocation3] sm:$0xff]  }
  0x30   : > { %s383_s17 = scalar_lea.vmem %s1441_s0, %s896_s14  ;;  %968 = vmatprep.subr.mxu0 %v1188_v0  ;;  %950 = vmatprep.subr.bf16.mxu1 %v1188_v0  ;;  %v605_v12 = vld [vmem:[#allocation5 + $0x78] sm:$0xff]  ;;  %v604_v13 = vld [vmem:[#allocation5 + $0x70] sm:$0xff]  ;;  %v603_v14 = vld [vmem:[#allocation5 + $0x68] sm:$0xff]  ;;  %s388_s12 = scalar_lea.vmem %s1450_s9, %s896_s14 }
  0x31   : > { %v1089_v3 = vld [vmem:[%s383_s17] sm:$0xff]   ;;  %v601_v26 = vld [vmem:[#allocation5 + $0x58] sm:$0xff]  ;;  %v600_v27 = vld [vmem:[#allocation5 + $0x50] sm:$0xff] }
  0x32   : > { %945 = vmatmul.mubr.msk.bf16.vlgmr.msra.gmra.mxu0 %vm410_vm2, %v1089_v3  ;;  %v880_v15 = vld [vmem:[%s1443_s2] ss:$0 sm:$0xff]  ;;  %v599_v28 = vld [vmem:[#allocation5 + $0x48] sm:$0xff]  ;;  %v597_v30 = vld [vmem:[#allocation5 + $0x38] sm:$0xff] }
  0x33   : > { %1000 = vmatprep.mubr.msk.f32.mxu0 %vm1189_vm0, %v1188_v0  ;;  %951 = vmatpush3.bf16.msra.mxu1 %v1091_v5  ;;  %v602_v25 = vld [vmem:[#allocation5 + $0x60] sm:$0xff]  ;;  %v596_v31 = vld [vmem:[#allocation5 + $0x30] sm:$0xff]  ;;  %v595_v32 = vld [vmem:[#allocation5 + $0x28] sm:$0xff] }
  0x34   : > { %952 = vmatprep.subr.bf16.mxu1 %v1188_v0  ;;  %969 = vmatpush3.msra.mxu0 %v605_v12  ;;  %v598_v29 = vld [vmem:[#allocation5 + $0x40] sm:$0xff]  ;;  %v593_v34 = vld [vmem:[#allocation5 + $0x18] sm:$0xff]  ;;  %v592_v35 = vld [vmem:[#allocation5 + $0x10] sm:$0xff] }
  0x35   : > { %970 = vmatprep.subr.mxu0 %v1188_v0  ;;  %v594_v33 = vld [vmem:[#allocation5 + $0x20] sm:$0xff]  ;;  %v591_v36 = vld [vmem:[#allocation5 + $0x8] sm:$0xff]  ;;  %v699_v38 = vld [vmem:[%s1448_s7 + $0x78] sm:$0xff] }
  0x36   : > { %971 = vmatpush3.msra.mxu0 %v604_v13  ;;  %v590_v37 = vld [vmem:[#allocation5] sm:$0xff]  ;;  %v698_v39 = vld [vmem:[%s1448_s7 + $0x70] sm:$0xff]  ;;  %v697_v40 = vld [vmem:[%s1448_s7 + $0x68] sm:$0xff] }
  0x37   : > { %953 = vmatpush3.bf16.msra.mxu1 %v1092_v6  ;;  %972 = vmatprep.subr.mxu0 %v1188_v0  ;;  %v696_v41 = vld [vmem:[%s1448_s7 + $0x60] sm:$0xff]  ;;  %v695_v42 = vld [vmem:[%s1448_s7 + $0x58] sm:$0xff]  ;;  %v694_v43 = vld [vmem:[%s1448_s7 + $0x50] sm:$0xff] }
  0x38   : > { %954 = vmatprep.subr.bf16.mxu1 %v1188_v0  ;;  %973 = vmatpush3.msra.mxu0 %v603_v14  ;;  %v693_v44 = vld [vmem:[%s1448_s7 + $0x48] sm:$0xff]  ;;  %v692_v45 = vld [vmem:[%s1448_s7 + $0x40] sm:$0xff]  ;;  %v691_v46 = vld [vmem:[%s1448_s7 + $0x38] sm:$0xff] }
  0x39   : > { %974 = vmatprep.subr.mxu0 %v1188_v0  ;;  %v690_v47 = vld [vmem:[%s1448_s7 + $0x30] sm:$0xff]  ;;  %v689_v48 = vld [vmem:[%s1448_s7 + $0x28] sm:$0xff]  ;;  %v688_v49 = vld [vmem:[%s1448_s7 + $0x20] sm:$0xff] }
  0x3a   : > { %975 = vmatpush3.msra.mxu0 %v602_v25  ;;  %v687_v50 = vld [vmem:[%s1448_s7 + $0x18] sm:$0xff]  ;;  %v883_v51 = vld [vmem:[%s1445_s4] ss:$0 sm:$0xff]  ;;  %v686_v5 = vld [vmem:[%s1448_s7 + $0x10] sm:$0xff] }
  0x3b   : > { %955 = vmatpush3.bf16.msra.mxu1 %v1093_v7  ;;  %976 = vmatprep.subr.mxu0 %v1188_v0  ;;  %v685_v6 = vld [vmem:[%s1448_s7 + $0x8] sm:$0xff]  ;;  %v684_v7 = vld [vmem:[%s1448_s7] sm:$0xff] }
  0x3c   : > { %956 = vmatprep.subr.bf16.mxu1 %v1188_v0  ;;  %977 = vmatpush3.msra.mxu0 %v601_v26  ;;  %v893_v13 = vld [vmem:[%s1449_s8] ss:$0 sm:$0xff] }
  0x3d   : > { %978 = vmatprep.subr.mxu0 %v1188_v0 }
  0x3e   : > { %979 = vmatpush3.msra.mxu0 %v600_v27 }
  0x3f   : > { %957 = vmatpush3.bf16.msra.mxu1 %v1094_v8  ;;  %980 = vmatprep.subr.mxu0 %v1188_v0  ;;  %v892_v8 = vld [vmem:[%s1447_s6] ss:$0 sm:$0xff] }
  0x40   : > { %958 = vmatprep.subr.bf16.mxu1 %v1188_v0  ;;  %981 = vmatpush3.msra.mxu0 %v599_v28 }
  0x41   : > { %982 = vmatprep.subr.mxu0 %v1188_v0 }
  0x42   : > { %983 = vmatpush3.msra.mxu0 %v598_v29 }
  0x43   : > { %959 = vmatpush3.bf16.msra.mxu1 %v1095_v9  ;;  %984 = vmatprep.subr.mxu0 %v1188_v0 }
  0x44   : > { %960 = vmatprep.subr.bf16.mxu1 %v1188_v0  ;;  %985 = vmatpush3.msra.mxu0 %v597_v30 }
  0x45   : > { %986 = vmatprep.subr.mxu0 %v1188_v0 }
  0x46   : > { %987 = vmatpush3.msra.mxu0 %v596_v31 }
  0x47   : > { %961 = vmatpush3.bf16.msra.mxu1 %v1096_v10  ;;  %988 = vmatprep.subr.mxu0 %v1188_v0 }
  0x48   : > { %962 = vmatprep.subr.bf16.mxu1 %v1188_v0  ;;  %989 = vmatpush3.msra.mxu0 %v595_v32 }
  0x49   : > { %990 = vmatprep.subr.mxu0 %v1188_v0 }
  0x4a   : > { %991 = vmatpush3.msra.mxu0 %v594_v33 }
  0x4b   : > { %963 = vmatpush3.bf16.msra.mxu1 %v1097_v11  ;;  %992 = vmatprep.subr.mxu0 %v1188_v0 }
  0x4c   : > { %1003 = vmatprep.subr.mxu1 %v1188_v0  ;;  %993 = vmatpush3.msra.mxu0 %v593_v34 }
  0x4d   : > { %994 = vmatprep.subr.mxu0 %v1188_v0 }
  0x4e   : > { %995 = vmatpush3.msra.mxu0 %v592_v35 }
  0x4f   : > { %996 = vmatprep.subr.mxu0 %v1188_v0 }
  0x50   : > { %997 = vmatpush3.msra.mxu0 %v591_v36 }
  0x51   : > { %998 = vmatprep.subr.mxu0 %v1188_v0 }
  0x52   : > { %999 = vmatpush3.msra.mxu0 %v590_v37 }
  0xf2   : > { %v452_v16 = vpop.f32.mrf.mxu0 }
  0xf3   : > { %v453_v18 = vadd.f32 %v880_v15, %v452_v16 }
  0xf4   : > { %v946_v17 = vpop.f32.mrf.mxu0 }
  0xf5   : > { %v459_v22 = vmax.f32 %v453_v18, 0.0 }
  0xf6   : > { %v455_v19 = vpop.f32.mrf.mxu0 }
  0xf7   : > { %v456_v20 = vadd.f32 %v880_v15, %v455_v19 }
  0xf8   : > { %v947_v21 = vpop.f32.mrf.mxu0 }
  0xf9   : > { %v460_v23 = vmax.f32 %v456_v20, 0.0 }
  0xfb   : > { %v461_v24 = vpack.c.bf16 %v460_v23, %v459_v22 }
  0xfd   : > { %965 = vmatmul.mubr.bf16.vlgmr.msra.gmra.mxu1 %v461_v24 }
  0xfe   : > { %1035 = vmatprep.mubr.msk.f32.mxu1 %vm1189_vm0, %v1188_v0  ;;  %1004 = vmatpush3.msra.mxu1 %v699_v38 }
  0xff   : > { %1005 = vmatprep.subr.mxu1 %v1188_v0 }
 0x100   : > { %1006 = vmatpush3.msra.mxu1 %v698_v39 }
 0x101   : > { %1007 = vmatprep.subr.mxu1 %v1188_v0 }
 0x102   : > { %1008 = vmatpush3.msra.mxu1 %v697_v40 }
 0x103   : > { %1009 = vmatprep.subr.mxu1 %v1188_v0 }
 0x104   : > { %1010 = vmatpush3.msra.mxu1 %v696_v41 }
 0x105   : > { %1011 = vmatprep.subr.mxu1 %v1188_v0 }
 0x106   : > { %1012 = vmatpush3.msra.mxu1 %v695_v42 }
 0x107   : > { %1013 = vmatprep.subr.mxu1 %v1188_v0 }
 0x108   : > { %1014 = vmatpush3.msra.mxu1 %v694_v43 }
 0x109   : > { %1015 = vmatprep.subr.mxu1 %v1188_v0 }
 0x10a   : > { %1016 = vmatpush3.msra.mxu1 %v693_v44 }
 0x10b   : > { %1017 = vmatprep.subr.mxu1 %v1188_v0 }
 0x10c   : > { %1018 = vmatpush3.msra.mxu1 %v692_v45 }
 0x10d   : > { %1019 = vmatprep.subr.mxu1 %v1188_v0 }
 0x10e   : > { %1020 = vmatpush3.msra.mxu1 %v691_v46 }
 0x10f   : > { %1021 = vmatprep.subr.mxu1 %v1188_v0 }
 0x110   : > { %1022 = vmatpush3.msra.mxu1 %v690_v47 }
 0x111   : > { %1023 = vmatprep.subr.mxu1 %v1188_v0 }
 0x112   : > { %1024 = vmatpush3.msra.mxu1 %v689_v48 }
 0x113   : > { %1025 = vmatprep.subr.mxu1 %v1188_v0 }
 0x114   : > { %1026 = vmatpush3.msra.mxu1 %v688_v49 }
 0x115   : > { %1027 = vmatprep.subr.mxu1 %v1188_v0 }
 0x116   : > { %1028 = vmatpush3.msra.mxu1 %v687_v50 }
 0x117   : > { %1029 = vmatprep.subr.mxu1 %v1188_v0 }
 0x118   : > { %1030 = vmatpush3.msra.mxu1 %v686_v5 }
 0x119   : > { %1031 = vmatprep.subr.mxu1 %v1188_v0 }
 0x11a   : > { %1032 = vmatpush3.msra.mxu1 %v685_v6 }
 0x11b   : > { %1033 = vmatprep.subr.mxu1 %v1188_v0 }
 0x11c   : > { %1034 = vmatpush3.msra.mxu1 %v684_v7 }
 0x1bd   : > { %v567_v52 = vpop.f32.mrf.mxu1 }
 0x1be   : > { %v568_v54 = vadd.f32 %v883_v51, %v567_v52 }
 0x1bf   : > { %v966_v53 = vpop.f32.mrf.mxu1 }
 0x1c0   : > { %v574_v58 = vmax.f32 %v568_v54, 0.0 }
 0x1c1   : > { %v570_v55 = vpop.f32.mrf.mxu1 }
 0x1c2   : > { %v571_v56 = vadd.f32 %v883_v51, %v570_v55 }
 0x1c3   : > { %v967_v57 = vpop.f32.mrf.mxu1 }
 0x1c4   : > { %v575_v59 = vmax.f32 %v571_v56, 0.0 }
 0x1c6   : > { %v576_v60 = vmax.f32 %v574_v58, %v575_v59 }
 0x1c8   : > { %v577_v61 = vrot.slane %v576_v60, 4 }
 0x1ca   : > { %v578_v62 = vmax.f32 %v576_v60, %v577_v61 }
 0x1cc   : > { %v579_v63 = vrot.slane %v578_v62, 2 }
 0x1ce   : > { %v580_v1 = vmax.f32 %v578_v62, %v579_v63 }
 0x1d0   : > { %v581_v2 = vrot.slane %v580_v1, 1 }
 0x1d2   : > { %v582_v3 = vmax.f32 %v580_v1, %v581_v2 }
 0x1d4   : > { %v584_v4 = vmax.f32 %v582_v3, -3.4028235e+38 }
 0x1d6   : > { %1001 = vmatmul.mubr.f32.vlgmr.msra.gmra.mxu0 %v584_v4 }
 0x296   : > { %v679_v9 = vpop.f32.mrf.mxu0 }
 0x297   : > { %v680_v10 = vadd.f32 %v892_v8, %v679_v9 }
 0x298   : > { %v1002_v11 = vpop.f32.mrf.mxu0 }
 0x299   : > { %v683_v12 = vmax.f32 %v680_v10, 0.0 }
 0x29b   : > { %1036 = vmatmul.mubr.f32.vlgmr.msra.gmra.mxu1 %v683_v12 }
 0x35b   : > { %v773_v0 = vpop.f32.mrf.mxu1 }
 0x35c   : > { %v774_v14 = vadd.f32 %v893_v13, %v773_v0 }
 0x35d   : > { %v1037_v15 = vpop.f32.mrf.mxu1 }
 0x35e   : > { %777 = vst [vmem:[%s388_s12] sm:$0xff] %v774_v14 }
 0x35f PF: > { %s21_s11 = sadd.s32 1, %s1180_s11   ;;  %s1454_s30 = smov %s1176_s10 }
 0x360   : > { %p18_p3 = scmp.ge.s32.totalorder %s21_s11, 4   ;;  %s1455_s10 = smov %s1457_s13 }
 0x362   :  { %20 = sbr.rel (!%p18_p3) target bundleno = 3 (0x3), region = 103 }
 0x367   :  { %797 = vsyncpa [#allocation4], 1 }
 0x368   :  { %799 = vsyncpa [#allocation4 + $0x1], 1 }
 0x369   :  { %800 = vsyncpa [#allocation6], 1 }

// kernel: _lambda_.3
= control target key start
LH: loop header
LB: loop body
LE: loop exit
PB: predicated region body
PF: predicated region fallthrough
CT: control target
= control target key end

     0   :  { %s1122_s30 = smov 0   ;;  %s1124_s10 = smov 0   ;;  %s1347_s0 = inlined_call_operand.vmem [shape: bf16[2,16,8], index: 0, kind: input, shape index: {}]   ;;  %s1348_s1 = inlined_call_operand.vmem [shape: bf16[2,8,128], index: 1, kind: input, shape index: {}]   ;;  %s1349_s2 = inlined_call_operand.vmem [shape: f32[1,128], index: 2, kind: input, shape index: {}]   ;;  %s1350_s3 = inlined_call_operand.vmem [shape: bf16[128,128], index: 3, kind: input, shape index: {}]   ;;  %s1351_s4 = inlined_call_operand.vmem [shape: f32[1,128], index: 4, kind: input, shape index: {}]   ;;  %s1352_s5 = inlined_call_operand.vmem [shape: f32[128,128], index: 5, kind: input, shape index: {}]   ;;  %s1353_s6 = inlined_call_operand.vmem [shape: f32[1,128], index: 6, kind: input, shape index: {}]   ;;  %s1354_s7 = inlined_call_operand.vmem [shape: f32[128,128], index: 7, kind: input, shape index: {}]   ;;  %s1355_s8 = inlined_call_operand.vmem [shape: f32[1,128], index: 8, kind: input, shape index: {}]   ;;  %s1356_s9 = inlined_call_operand.vmem [shape: f32[2,8,128], index: 9, kind: output, shape index: {}]  }
   0x1   :  { %s1126_s11 = smov 0  }
   0x2 LB: > { %s31_s12 = sadd.s32 1, %s1064_s10  ;;  %p848_p0 = scmp.ge.s32.totalorder %s1068_s11, 1  ;;  %s1068_s11 = sphi %s1126_s11, %s19_s11   ;;  %s1064_s10 = sphi %s1124_s10, %s1358_s10   ;;  %s1060_s30 = sphi %s1122_s30, %s1357_s30  }
   0x3   : > { %p33_p1 = scmp.ge.s32.totalorder %s31_s12, 2  ;;  %p315_p2 = scmp.lt.s32.totalorder %s1068_s11, 3 }
   0x5   : > { %s1360_s12 = smov (%p33_p1, %s31_s12), 0  ;;  %p316_p3 = pnand %p848_p0, %p315_p2 }
   0x6   : > { %p359_p4 = scmp.lt.s32.totalorder (!%p316_p3), %s1060_s30, 1 }
   0x7   : > { %319 = sbr.rel (%p316_p3) target bundleno = 833 (0x341), region = 56 }
   0xc   : > { %v1038_v0 = vld [vmem:[%s1350_s3 + $0x38] sm:$0xff]   ;;  %v1070_v1 = vmov 0.0   ;;  %vm1071_vm0 = vmmov 0   ;;  %s1362_s30 = smov (!%p359_p4, %s1060_s30), 1  ;;  %v1039_v2 = vld [vmem:[%s1350_s3 + $0x30] sm:$0xff]   ;;  %vm401_vm1 = vcmask 1043456  }
   0xd   : > { %915 = vmatprep.subr.bf16.mxu0 %v1070_v1  ;;  %917 = vmatprep.mubr.msk.bf16.mxu0 %vm1071_vm0, %v1070_v1  ;;  %s869_s17 = sshll.u32 %s1362_s30, 3  ;;  %s851_s18 = sshll.u32 %s1362_s30, 2  ;;  %vm397_vm2 = vcmask 64512   ;;  %v1040_v3 = vld [vmem:[%s1350_s3 + $0x28] sm:$0xff]   ;;  %v1041_v7 = vld [vmem:[%s1350_s3 + $0x20] sm:$0xff]   ;;  %v1042_v8 = vld [vmem:[%s1350_s3 + $0x18] sm:$0xff]  }
   0xe   : > { %921 = vmatprep.subr.bf16.mxu1 %v1070_v1  ;;  %937 = vmatprep.mubr.msk.bf16.mxu1 %vm1071_vm0, %v1070_v1  ;;  %s366_s21 = scalar_lea.vmem %s1347_s0, %s869_s17  ;;  %s371_s24 = scalar_lea.vmem %s1348_s1, %s851_s18  ;;  %v1043_v9 = vld [vmem:[%s1350_s3 + $0x10] sm:$0xff]   ;;  %v1044_v10 = vld [vmem:[%s1350_s3 + $0x8] sm:$0xff]   ;;  %v1045_v11 = vld [vmem:[%s1350_s3] sm:$0xff]  }
   0xf   : > { %922 = vmatpush3.bf16.msra.mxu1 %v1038_v0  ;;  %v384_v4 = vld [vmem:[%s371_s24] sm:$0xf]  ;;  %v592_v12 = vld [vmem:[%s1352_s5 + $0x78] sm:$0xff]  ;;  %v591_v13 = vld [vmem:[%s1352_s5 + $0x70] sm:$0xff]  ;;  %s375_s14 = scalar_lea.vmem %s1356_s9, %s869_s17 }
  0x10   : > { %923 = vmatprep.subr.bf16.mxu1 %v1070_v1  ;;  %v403_v5 = vsel %vm401_vm1, %v384_v4, 0  ;;  %v1037_v6 = vld [vmem:[%s366_s21] sm:$0xff]   ;;  %v590_v14 = vld [vmem:[%s1352_s5 + $0x68] sm:$0xff]  ;;  %v588_v26 = vld [vmem:[%s1352_s5 + $0x58] sm:$0xff] }
  0x11   : > { %916 = vmatpush3.bf16.msra.mxu0 %v403_v5  ;;  %v853_v15 = vld [vmem:[%s1349_s2] ss:$0 sm:$0xff]  ;;  %v587_v27 = vld [vmem:[%s1352_s5 + $0x50] sm:$0xff]  ;;  %v586_v28 = vld [vmem:[%s1352_s5 + $0x48] sm:$0xff] }
  0x12   : > { %941 = vmatprep.subr.mxu0 %v1070_v1  ;;  %v589_v25 = vld [vmem:[%s1352_s5 + $0x60] sm:$0xff]  ;;  %v584_v30 = vld [vmem:[%s1352_s5 + $0x38] sm:$0xff]  ;;  %v583_v31 = vld [vmem:[%s1352_s5 + $0x30] sm:$0xff] }
  0x13   : > { %924 = vmatpush3.bf16.msra.mxu1 %v1039_v2  ;;  %v585_v29 = vld [vmem:[%s1352_s5 + $0x40] sm:$0xff]  ;;  %v582_v32 = vld [vmem:[%s1352_s5 + $0x28] sm:$0xff]  ;;  %v580_v34 = vld [vmem:[%s1352_s5 + $0x18] sm:$0xff] }
  0x14   : > { %925 = vmatprep.subr.bf16.mxu1 %v1070_v1  ;;  %918 = vmatmul.mubr.msk.bf16.vlgmr.msra.gmra.mxu0 %vm397_vm2, %v1037_v6  ;;  %v581_v33 = vld [vmem:[%s1352_s5 + $0x20] sm:$0xff]  ;;  %v579_v35 = vld [vmem:[%s1352_s5 + $0x10] sm:$0xff]  ;;  %v578_v36 = vld [vmem:[%s1352_s5 + $0x8] sm:$0xff] }
  0x15   : > { %973 = vmatprep.mubr.msk.f32.mxu0 %vm1071_vm0, %v1070_v1  ;;  %942 = vmatpush3.msra.mxu0 %v592_v12  ;;  %v577_v37 = vld [vmem:[%s1352_s5] sm:$0xff]  ;;  %v686_v38 = vld [vmem:[%s1354_s7 + $0x78] sm:$0xff]  ;;  %v685_v39 = vld [vmem:[%s1354_s7 + $0x70] sm:$0xff] }
  0x16   : > { %943 = vmatprep.subr.mxu0 %v1070_v1  ;;  %v684_v40 = vld [vmem:[%s1354_s7 + $0x68] sm:$0xff]  ;;  %v683_v41 = vld [vmem:[%s1354_s7 + $0x60] sm:$0xff]  ;;  %v682_v42 = vld [vmem:[%s1354_s7 + $0x58] sm:$0xff] }
  0x17   : > { %926 = vmatpush3.bf16.msra.mxu1 %v1040_v3  ;;  %944 = vmatpush3.msra.mxu0 %v591_v13  ;;  %v681_v43 = vld [vmem:[%s1354_s7 + $0x50] sm:$0xff]  ;;  %v680_v44 = vld [vmem:[%s1354_s7 + $0x48] sm:$0xff]  ;;  %v679_v45 = vld [vmem:[%s1354_s7 + $0x40] sm:$0xff] }
  0x18   : > { %927 = vmatprep.subr.bf16.mxu1 %v1070_v1  ;;  %945 = vmatprep.subr.mxu0 %v1070_v1  ;;  %v678_v46 = vld [vmem:[%s1354_s7 + $0x38] sm:$0xff]  ;;  %v677_v47 = vld [vmem:[%s1354_s7 + $0x30] sm:$0xff]  ;;  %v676_v48 = vld [vmem:[%s1354_s7 + $0x28] sm:$0xff] }
  0x19   : > { %946 = vmatpush3.msra.mxu0 %v590_v14  ;;  %v675_v49 = vld [vmem:[%s1354_s7 + $0x20] sm:$0xff]  ;;  %v674_v50 = vld [vmem:[%s1354_s7 + $0x18] sm:$0xff]  ;;  %v673_v5 = vld [vmem:[%s1354_s7 + $0x10] sm:$0xff] }
  0x1a   : > { %947 = vmatprep.subr.mxu0 %v1070_v1  ;;  %v856_v51 = vld [vmem:[%s1351_s4] ss:$0 sm:$0xff]  ;;  %v672_v6 = vld [vmem:[%s1354_s7 + $0x8] sm:$0xff] }
  0x1b   : > { %928 = vmatpush3.bf16.msra.mxu1 %v1041_v7  ;;  %948 = vmatpush3.msra.mxu0 %v589_v25  ;;  %v671_v7 = vld [vmem:[%s1354_s7] sm:$0xff] }
  0x1c   : > { %929 = vmatprep.subr.bf16.mxu1 %v1070_v1  ;;  %949 = vmatprep.subr.mxu0 %v1070_v1  ;;  %v866_v13 = vld [vmem:[%s1355_s8] ss:$0 sm:$0xff] }
  0x1d   : > { %950 = vmatpush3.msra.mxu0 %v588_v26 }
  0x1e   : > { %951 = vmatprep.subr.mxu0 %v1070_v1 }
  0x1f   : > { %930 = vmatpush3.bf16.msra.mxu1 %v1042_v8  ;;  %952 = vmatpush3.msra.mxu0 %v587_v27  ;;  %v865_v8 = vld [vmem:[%s1353_s6] ss:$0 sm:$0xff] }
  0x20   : > { %931 = vmatprep.subr.bf16.mxu1 %v1070_v1  ;;  %953 = vmatprep.subr.mxu0 %v1070_v1 }
  0x21   : > { %954 = vmatpush3.msra.mxu0 %v586_v28 }
  0x22   : > { %955 = vmatprep.subr.mxu0 %v1070_v1 }
  0x23   : > { %932 = vmatpush3.bf16.msra.mxu1 %v1043_v9  ;;  %956 = vmatpush3.msra.mxu0 %v585_v29 }
  0x24   : > { %933 = vmatprep.subr.bf16.mxu1 %v1070_v1  ;;  %957 = vmatprep.subr.mxu0 %v1070_v1 }
  0x25   : > { %958 = vmatpush3.msra.mxu0 %v584_v30 }
  0x26   : > { %959 = vmatprep.subr.mxu0 %v1070_v1 }
  0x27   : > { %934 = vmatpush3.bf16.msra.mxu1 %v1044_v10  ;;  %960 = vmatpush3.msra.mxu0 %v583_v31 }
  0x28   : > { %935 = vmatprep.subr.bf16.mxu1 %v1070_v1  ;;  %961 = vmatprep.subr.mxu0 %v1070_v1 }
  0x29   : > { %962 = vmatpush3.msra.mxu0 %v582_v32 }
  0x2a   : > { %963 = vmatprep.subr.mxu0 %v1070_v1 }
  0x2b   : > { %936 = vmatpush3.bf16.msra.mxu1 %v1045_v11  ;;  %964 = vmatpush3.msra.mxu0 %v581_v33 }
  0x2c   : > { %976 = vmatprep.subr.mxu1 %v1070_v1  ;;  %965 = vmatprep.subr.mxu0 %v1070_v1 }
  0x2d   : > { %966 = vmatpush3.msra.mxu0 %v580_v34 }
  0x2e   : > { %967 = vmatprep.subr.mxu0 %v1070_v1 }
  0x2f   : > { %968 = vmatpush3.msra.mxu0 %v579_v35 }
  0x30   : > { %969 = vmatprep.subr.mxu0 %v1070_v1 }
  0x31   : > { %970 = vmatpush3.msra.mxu0 %v578_v36 }
  0x32   : > { %971 = vmatprep.subr.mxu0 %v1070_v1 }
  0x33   : > { %972 = vmatpush3.msra.mxu0 %v577_v37 }
  0xd4   : > { %v439_v16 = vpop.f32.mrf.mxu0 }
  0xd5   : > { %v440_v18 = vadd.f32 %v853_v15, %v439_v16 }
  0xd6   : > { %v919_v17 = vpop.f32.mrf.mxu0 }
  0xd7   : > { %v446_v22 = vmax.f32 %v440_v18, 0.0 }
  0xd8   : > { %v442_v19 = vpop.f32.mrf.mxu0 }
  0xd9   : > { %v443_v20 = vadd.f32 %v853_v15, %v442_v19 }
  0xda   : > { %v920_v21 = vpop.f32.mrf.mxu0 }
  0xdb   : > { %v447_v23 = vmax.f32 %v443_v20, 0.0 }
  0xdd   : > { %v448_v24 = vpack.c.bf16 %v447_v23, %v446_v22 }
  0xdf   : > { %938 = vmatmul.mubr.bf16.vlgmr.msra.gmra.mxu1 %v448_v24 }
  0xe0   : > { %1008 = vmatprep.mubr.msk.f32.mxu1 %vm1071_vm0, %v1070_v1  ;;  %977 = vmatpush3.msra.mxu1 %v686_v38 }
  0xe1   : > { %978 = vmatprep.subr.mxu1 %v1070_v1 }
  0xe2   : > { %979 = vmatpush3.msra.mxu1 %v685_v39 }
  0xe3   : > { %980 = vmatprep.subr.mxu1 %v1070_v1 }
  0xe4   : > { %981 = vmatpush3.msra.mxu1 %v684_v40 }
  0xe5   : > { %982 = vmatprep.subr.mxu1 %v1070_v1 }
  0xe6   : > { %983 = vmatpush3.msra.mxu1 %v683_v41 }
  0xe7   : > { %984 = vmatprep.subr.mxu1 %v1070_v1 }
  0xe8   : > { %985 = vmatpush3.msra.mxu1 %v682_v42 }
  0xe9   : > { %986 = vmatprep.subr.mxu1 %v1070_v1 }
  0xea   : > { %987 = vmatpush3.msra.mxu1 %v681_v43 }
  0xeb   : > { %988 = vmatprep.subr.mxu1 %v1070_v1 }
  0xec   : > { %989 = vmatpush3.msra.mxu1 %v680_v44 }
  0xed   : > { %990 = vmatprep.subr.mxu1 %v1070_v1 }
  0xee   : > { %991 = vmatpush3.msra.mxu1 %v679_v45 }
  0xef   : > { %992 = vmatprep.subr.mxu1 %v1070_v1 }
  0xf0   : > { %993 = vmatpush3.msra.mxu1 %v678_v46 }
  0xf1   : > { %994 = vmatprep.subr.mxu1 %v1070_v1 }
  0xf2   : > { %995 = vmatpush3.msra.mxu1 %v677_v47 }
  0xf3   : > { %996 = vmatprep.subr.mxu1 %v1070_v1 }
  0xf4   : > { %997 = vmatpush3.msra.mxu1 %v676_v48 }
  0xf5   : > { %998 = vmatprep.subr.mxu1 %v1070_v1 }
  0xf6   : > { %999 = vmatpush3.msra.mxu1 %v675_v49 }
  0xf7   : > { %1000 = vmatprep.subr.mxu1 %v1070_v1 }
  0xf8   : > { %1001 = vmatpush3.msra.mxu1 %v674_v50 }
  0xf9   : > { %1002 = vmatprep.subr.mxu1 %v1070_v1 }
  0xfa   : > { %1003 = vmatpush3.msra.mxu1 %v673_v5 }
  0xfb   : > { %1004 = vmatprep.subr.mxu1 %v1070_v1 }
  0xfc   : > { %1005 = vmatpush3.msra.mxu1 %v672_v6 }
  0xfd   : > { %1006 = vmatprep.subr.mxu1 %v1070_v1 }
  0xfe   : > { %1007 = vmatpush3.msra.mxu1 %v671_v7 }
 0x19f   : > { %v554_v52 = vpop.f32.mrf.mxu1 }
 0x1a0   : > { %v555_v54 = vadd.f32 %v856_v51, %v554_v52 }
 0x1a1   : > { %v939_v53 = vpop.f32.mrf.mxu1 }
 0x1a2   : > { %v561_v58 = vmax.f32 %v555_v54, 0.0 }
 0x1a3   : > { %v557_v55 = vpop.f32.mrf.mxu1 }
 0x1a4   : > { %v558_v56 = vadd.f32 %v856_v51, %v557_v55 }
 0x1a5   : > { %v940_v57 = vpop.f32.mrf.mxu1 }
 0x1a6   : > { %v562_v59 = vmax.f32 %v558_v56, 0.0 }
 0x1a8   : > { %v563_v60 = vmax.f32 %v561_v58, %v562_v59 }
 0x1aa   : > { %v564_v61 = vrot.slane %v563_v60, 4 }
 0x1ac   : > { %v565_v62 = vmax.f32 %v563_v60, %v564_v61 }
 0x1ae   : > { %v566_v63 = vrot.slane %v565_v62, 2 }
 0x1b0   : > { %v567_v0 = vmax.f32 %v565_v62, %v566_v63 }
 0x1b2   : > { %v568_v2 = vrot.slane %v567_v0, 1 }
 0x1b4   : > { %v569_v3 = vmax.f32 %v567_v0, %v568_v2 }
 0x1b6   : > { %v571_v4 = vmax.f32 %v569_v3, -3.4028235e+38 }
 0x1b8   : > { %974 = vmatmul.mubr.f32.vlgmr.msra.gmra.mxu0 %v571_v4 }
 0x278   : > { %v666_v9 = vpop.f32.mrf.mxu0 }
 0x279   : > { %v667_v10 = vadd.f32 %v865_v8, %v666_v9 }
 0x27a   : > { %v975_v11 = vpop.f32.mrf.mxu0 }
 0x27b   : > { %v670_v12 = vmax.f32 %v667_v10, 0.0 }
 0x27d   : > { %1009 = vmatmul.mubr.f32.vlgmr.msra.gmra.mxu1 %v670_v12 }
 0x33d   : > { %v760_v1 = vpop.f32.mrf.mxu1 }
 0x33e   : > { %v761_v14 = vadd.f32 %v866_v13, %v760_v1 }
 0x33f   : > { %v1010_v15 = vpop.f32.mrf.mxu1 }
 0x340   : > { %764 = vst [vmem:[%s375_s14] sm:$0xff] %v761_v14 }
 0x341 PF: > { %s19_s11 = sadd.s32 1, %s1068_s11   ;;  %s1357_s30 = smov %s1064_s10 }
 0x342   : > { %p16_p5 = scmp.ge.s32.totalorder %s19_s11, 4   ;;  %s1358_s10 = smov %s1360_s12 }
 0x344   :  { %18 = sbr.rel (!%p16_p5) target bundleno = 2 (0x2), region = 97 }

</bundles_post_ra>
